<compile_context>
chip_gen: v7x
topology: tpu7x:2x2x1
jax: 0.10.0
libtpu: 0.0.40
codegen_flags: <defaults>
</compile_context>

<pallas_src>
import jax
import jax.numpy as jnp
import numpy as np
from jax.experimental import pallas as pl
from jax.experimental.pallas import tpu as pltpu

EPS = 1e-5  # PyTorch InstanceNorm2d default eps


# ----------------------------------------------------------------------------
# Parameter re-layout (numpy, parameter-preparation time)
# ----------------------------------------------------------------------------
def build_fused_operands(params, height, width, mxu_dtype=jnp.float32):
    """Re-layout conv weights and build the per-tap roll shifts + boundary masks.

    For a flattened spatial index i = y*W + x, tap (ky,kx) with dy=ky-p, dx=kx-p
    reads in[ci, i + dy*W + dx]; that flat shift is a circular lane roll plus a
    0/1 mask for the zero-padding boundary:
        valid(i) = (0 <= y+dy < H) and (0 <= x+dx < W)
    """
    w0 = np.asarray(params[0][0], np.float32)
    ksize = int(w0.shape[-1])
    # padding = K//2 matches the reference ("SAME"-shaped output) only for odd K.
    assert ksize % 2 == 1, "filter_size must be odd (PyTorch padding=K//2 semantics)"
    pad = ksize // 2
    hw = height * width

    yy, xx = np.divmod(np.arange(hw), width)
    masks = np.zeros((ksize * ksize, 1, hw), np.float32)
    taps = []                                     # (kk, lane_roll_shift, needs_mask)
    for ky in range(ksize):
        for kx in range(ksize):
            dy, dx = ky - pad, kx - pad
            kk = ky * ksize + kx
            valid = ((yy + dy >= 0) & (yy + dy < height) &
                     (xx + dx >= 0) & (xx + dx < width))
            masks[kk, 0, :] = valid.astype(np.float32)
            shift = (-(dy * width + dx)) % hw     # roll(act, shift)[i] == act[i + d]
            taps.append((kk, shift, not (dy == 0 and dx == 0)))

    layer_ops = []
    out_channels = []
    for (w, b, gamma, beta) in params:
        w = np.asarray(w, np.float32)             # (Cout, Cin, K, K)
        cout, cin = int(w.shape[0]), int(w.shape[1])
        # (K*K, Cout, Cin) with kk = ky*K + kx ordering (matches masks/taps).
        wk = np.transpose(w, (2, 3, 0, 1)).reshape(ksize * ksize, cout, cin)
        layer_ops.append((
            jnp.asarray(wk, dtype=mxu_dtype),                       # MXU operand
            jnp.asarray(b, jnp.float32).reshape(cout, 1),           # bias
            jnp.asarray(gamma, jnp.float32).reshape(cout, 1),       # IN weight
            jnp.asarray(beta, jnp.float32).reshape(cout, 1),        # IN bias
        ))
        out_channels.append(cout)

    return jnp.asarray(masks), layer_ops, out_channels, taps, ksize


# ----------------------------------------------------------------------------
# Fused Pallas kernel: all layers for one batch element per grid step
# ----------------------------------------------------------------------------
def _make_fused_kernel(hw, taps, out_channels, mxu_dtype):
    inv_hw = 1.0 / float(hw)

    def kernel(*refs):
        # refs = (x_ref, mask_ref, [w, bias, gamma, beta] * L, o_ref)
        x_ref, m_ref, o_ref = refs[0], refs[1], refs[-1]
        act = x_ref[...]                                         # (Cin, HW) f32

        for li, cout in enumerate(out_channels):                 # static unroll
            w_ref = refs[2 + 4 * li]                             # (K*K, Cout, Cin)
            b_ref = refs[3 + 4 * li]                             # (Cout, 1)
            g_ref = refs[4 + 4 * li]                             # (Cout, 1)
            t_ref = refs[5 + 4 * li]                             # (Cout, 1)

            # --- Conv2d(pad=K//2): lane roll (XLU) + boundary mask (VPU)
            #     + small dense (Cout,Cin)@(Cin,HW) channel mix (MXU) ---------
            acc = None
            for (kk, shift, needs_mask) in taps:                 # static unroll
                shifted = act if shift == 0 else pltpu.roll(act, shift=shift, axis=1)
                if needs_mask:
                    shifted = shifted * m_ref[kk]                # (1, HW) mask
                term = jnp.dot(w_ref[kk], shifted.astype(mxu_dtype),
                               preferred_element_type=jnp.float32)
                acc = term if acc is None else acc + term        # (Cout, HW) f32

            # --- bias + ReLU (norm_pre_nl=False: nonlinearity before norm) ---
            acc = jnp.maximum(acc + b_ref[...], 0.0)

            # --- InstanceNorm2d (affine, biased var): per-channel lane stats,
            #     two-pass like the reference, no reshapes/relayouts ----------
            mean = jnp.sum(acc, axis=1, keepdims=True) * inv_hw  # (Cout, 1)
            cen = acc - mean
            var = jnp.sum(cen * cen, axis=1, keepdims=True) * inv_hw
            act = cen * jax.lax.rsqrt(var + EPS) * g_ref[...] + t_ref[...]

        o_ref[...] = act.astype(o_ref.dtype)

    return kernel


def make_se_attention_forward(params, n_batch, height, width,
                              mxu_dtype=jnp.float32):
    """Returns a jitted forward(x) running the whole SE_Attention stack in one
    Pallas call (grid over batch).  x is NCHW float32 (n_batch, Cin, H, W).

    mxu_dtype=jnp.bfloat16 feeds bf16 operands to the MXU (v6e/v5e throughput,
    half the weight footprint) while keeping accumulation and all norm math in
    f32; relax the comparison tolerance to ~2e-2 if enabled.
    """
    cin0 = int(np.asarray(params[0][0]).shape[1])
    hw = height * width
    masks, layer_ops, out_channels, taps, ksize = build_fused_operands(
        params, height, width, mxu_dtype=mxu_dtype)
    kernel = _make_fused_kernel(hw, taps, out_channels, mxu_dtype)
    cout_last = out_channels[-1]

    vmem = pltpu.MemorySpace.VMEM
    flat_ops = []
    in_specs = [
        # activations: one batch element per grid step, lane-dense (Cin, H*W)
        pl.BlockSpec((pl.Squeezed(), cin0, hw), lambda n: (n, 0, 0),
                     memory_space=vmem),
        # per-tap boundary masks, shared by every grid step
        pl.BlockSpec((ksize * ksize, 1, hw), lambda n: (0, 0, 0),
                     memory_space=vmem),
    ]
    for (wk, b, g, t) in layer_ops:
        kk_n, cout, cin = wk.shape
        flat_ops.extend([wk, b, g, t])
        in_specs.append(pl.BlockSpec((kk_n, cout, cin), lambda n: (0, 0, 0),
                                     memory_space=vmem))
        for _ in range(3):  # bias, gamma, beta: three (Cout, 1) columns
            in_specs.append(pl.BlockSpec((cout, 1), lambda n: (0, 0),
                                         memory_space=vmem))
    out_spec = pl.BlockSpec((pl.Squeezed(), cout_last, hw), lambda n: (n, 0, 0),
                            memory_space=vmem)

    # Advisory cost estimate for XLA scheduling around this launch-bound call.
    flops = 0
    cin = cin0
    for cout in out_channels:
        flops += n_batch * (2 * ksize * ksize * cout * cin * hw   # conv (MXU)
                            + 8 * cout * hw)                      # relu/norm (VPU)
        cin = cout
    bytes_accessed = 4 * n_batch * (cin0 + cout_last) * hw + int(masks.size) * 4
    for a in flat_ops:
        bytes_accessed += int(np.prod(a.shape)) * int(a.dtype.itemsize)

    fused = pl.pallas_call(
        kernel,
        grid=(n_batch,),
        in_specs=in_specs,
        out_specs=out_spec,
        out_shape=jax.ShapeDtypeStruct((n_batch, cout_last, hw), jnp.float32),
        compiler_params=pltpu.CompilerParams(
            # batch iterations are independent; on v7x this shards across the
            # 2 TensorCores, on v5e/v6e it is just a serial loop.
            dimension_semantics=("parallel",)),
        cost_estimate=pl.CostEstimate(
            flops=int(flops),
            transcendentals=int(n_batch * sum(out_channels)),    # rsqrt per (n,c)
            bytes_accessed=int(bytes_accessed)),
    )

    @jax.jit
    def forward(x):
        # NCHW -> (N, C, H*W): a pure reshape (H, W contiguous), no transpose.
        x2 = x.astype(jnp.float32).reshape(n_batch, cin0, hw)
        out = fused(x2, masks, *flat_ops)
        return out.reshape(n_batch, cout_last, height, width)

    return forward


# ----------------------------------------------------------------------------
# Parameter construction (deterministic; mirrors SE_Attention.__init__)
# ----------------------------------------------------------------------------
def _orthogonal(key, shape):
    """Row-orthonormal init like torch.nn.init.orthogonal_ on a conv weight."""
    rows = shape[0]
    cols = int(np.prod(shape[1:]))
    a = jax.random.normal(key, (max(rows, cols), min(rows, cols)), jnp.float32)
    q, r = jnp.linalg.qr(a)
    q = q * jnp.sign(jnp.diagonal(r))
    if rows < cols:
        q = q.T
    return q[:rows, :cols].reshape(shape).astype(jnp.float32)


def make_se_attention_params(key, input_size, output_size, filter_size, layers):
    """Channel schedule: last layer -> output_size; i < layers//2 halves; else doubles."""
    params = []
    curr = input_size
    for i in range(layers):
        if i == layers - 1:
            nxt = output_size
        elif i < layers // 2:
            nxt = curr // 2
        else:
            nxt = curr * 2
        key, sub = jax.random.split(key)
        w = _orthogonal(sub, (nxt, curr, filter_size, filter_size))
        b = jnp.zeros((nxt,), jnp.float32)           # init.constant_(conv.bias, 0)
        gamma = jnp.full((nxt,), 0.1, jnp.float32)   # init.constant_(norm.weight, 0.1)
        beta = jnp.zeros((nxt,), jnp.float32)        # init.constant_(norm.bias, 0)
        params.append((w, b, gamma, beta))
        curr = nxt
    return params


# ----------------------------------------------------------------------------
# Pure-JAX reference (correctness check for the Pallas path)
# ----------------------------------------------------------------------------
def _ref_forward(x, params):
    out = x
    for (w, b, gamma, beta) in params:
        y = jax.lax.conv_general_dilated(
            out, w, window_strides=(1, 1), padding="SAME",
            dimension_numbers=("NCHW", "OIHW", "NCHW"))
        y = y + b.reshape(1, -1, 1, 1)
        y = jnp.maximum(y, 0.0)
        mean = y.mean(axis=(2, 3), keepdims=True)
        var = jnp.square(y - mean).mean(axis=(2, 3), keepdims=True)
        y = (y - mean) * jax.lax.rsqrt(var + EPS)
        out = y * gamma.reshape(1, -1, 1, 1) + beta.reshape(1, -1, 1, 1)
    return out


if __name__ == "__main__":
    # SE_Attention(input_size=4, output_size=4, filter_size=3, layers=2)
    key = jax.random.PRNGKey(0)
    k_x, k_p = jax.random.split(key)

    x = jax.random.normal(k_x, (2, 4, 16, 16), jnp.float32)      # NCHW
    params = make_se_attention_params(k_p, input_size=4, output_size=4,
                                      filter_size=3, layers=2)

    forward = make_se_attention_forward(params, n_batch=2, height=16, width=16)
    out = jax.block_until_ready(forward(x))

    ref = jax.block_until_ready(_ref_forward(x, params))
    assert out.shape == (2, 4, 16, 16), out.shape
    np.testing.assert_allclose(np.asarray(out), np.asarray(ref),
                               rtol=1e-4, atol=1e-4)

    print("KERNEL_OK")
</pallas_src>

<mosaic_0001>
module attributes {stable_mosaic.version = 11 : i64} {
  func.func @kernel(%arg0: i32, %arg1: memref<1x4x256xf32, #tpu.memory_space<vmem>>, %arg2: memref<9x1x256xf32, #tpu.memory_space<vmem>>, %arg3: memref<9x2x4xf32, #tpu.memory_space<vmem>>, %arg4: memref<2x1xf32, #tpu.memory_space<vmem>>, %arg5: memref<2x1xf32, #tpu.memory_space<vmem>>, %arg6: memref<2x1xf32, #tpu.memory_space<vmem>>, %arg7: memref<9x4x2xf32, #tpu.memory_space<vmem>>, %arg8: memref<4x1xf32, #tpu.memory_space<vmem>>, %arg9: memref<4x1xf32, #tpu.memory_space<vmem>>, %arg10: memref<4x1xf32, #tpu.memory_space<vmem>>, %arg11: memref<1x4x256xf32, #tpu.memory_space<vmem>>) attributes {dimension_semantics = [#tpu.dimension_semantics<parallel>], iteration_bounds = array<i64: 2>, scalar_prefetch = 0 : i64, scratch_operands = 0 : i64, tpu.core_type = #tpu.core_type<tc>, window_params = [{transform_indices = @transform_0, window_bounds = array<i64: 1, 4, 256>}, {pipeline_mode = #tpu.pipeline_mode<synchronous>, transform_indices = @transform_1, window_bounds = array<i64: 9, 1, 256>}, {pipeline_mode = #tpu.pipeline_mode<synchronous>, transform_indices = @transform_2, window_bounds = array<i64: 9, 2, 4>}, {pipeline_mode = #tpu.pipeline_mode<synchronous>, transform_indices = @transform_3, window_bounds = array<i64: 2, 1>}, {pipeline_mode = #tpu.pipeline_mode<synchronous>, transform_indices = @transform_4, window_bounds = array<i64: 2, 1>}, {pipeline_mode = #tpu.pipeline_mode<synchronous>, transform_indices = @transform_5, window_bounds = array<i64: 2, 1>}, {pipeline_mode = #tpu.pipeline_mode<synchronous>, transform_indices = @transform_6, window_bounds = array<i64: 9, 4, 2>}, {pipeline_mode = #tpu.pipeline_mode<synchronous>, transform_indices = @transform_7, window_bounds = array<i64: 4, 1>}, {pipeline_mode = #tpu.pipeline_mode<synchronous>, transform_indices = @transform_8, window_bounds = array<i64: 4, 1>}, {pipeline_mode = #tpu.pipeline_mode<synchronous>, transform_indices = @transform_9, window_bounds = array<i64: 4, 1>}, {transform_indices = @transform_10, window_bounds = array<i64: 1, 4, 256>}]} {
    %c0 = arith.constant 0 : index
    %c0_0 = arith.constant 0 : index
    %c0_1 = arith.constant 0 : index
    %0 = vector.load %arg1[%c0, %c0_0, %c0_1] : memref<1x4x256xf32, #tpu.memory_space<vmem>>, vector<1x4x256xf32>
    %1 = vector.shape_cast %0 : vector<1x4x256xf32> to vector<4x256xf32>
    %c17_i32 = arith.constant 17 : i32
    %2 = tpu.dynamic_rotate %1 by %c17_i32 dim 1 : vector<4x256xf32>, i32 -> vector<4x256xf32>
    %c0_2 = arith.constant 0 : index
    %c0_3 = arith.constant 0 : index
    %c0_4 = arith.constant 0 : index
    %3 = vector.load %arg2[%c0_2, %c0_3, %c0_4] : memref<9x1x256xf32, #tpu.memory_space<vmem>>, vector<1x1x256xf32>
    %4 = vector.shape_cast %3 : vector<1x1x256xf32> to vector<1x256xf32>
    %5 = vector.broadcast %4 : vector<1x256xf32> to vector<4x256xf32>
    %6 = arith.mulf %2, %5 : vector<4x256xf32>
    %c0_5 = arith.constant 0 : index
    %c0_6 = arith.constant 0 : index
    %c0_7 = arith.constant 0 : index
    %7 = vector.load %arg3[%c0_5, %c0_6, %c0_7] : memref<9x2x4xf32, #tpu.memory_space<vmem>>, vector<1x2x4xf32>
    %8 = vector.shape_cast %7 : vector<1x2x4xf32> to vector<2x4xf32>
    %cst = arith.constant dense<0.000000e+00> : vector<2x256xf32>
    %9 = tpu.matmul %8, %6, %cst {dimension_numbers = #tpu.dot_dimension_numbers<[1], [0], [0], [1], [0, 0, 1, 1], [], []>} : vector<2x4xf32>, vector<4x256xf32>, vector<2x256xf32> -> vector<2x256xf32>
    %c16_i32 = arith.constant 16 : i32
    %10 = tpu.dynamic_rotate %1 by %c16_i32 dim 1 : vector<4x256xf32>, i32 -> vector<4x256xf32>
    %c1 = arith.constant 1 : index
    %c0_8 = arith.constant 0 : index
    %c0_9 = arith.constant 0 : index
    %11 = vector.load %arg2[%c1, %c0_8, %c0_9] : memref<9x1x256xf32, #tpu.memory_space<vmem>>, vector<1x1x256xf32>
    %12 = vector.shape_cast %11 : vector<1x1x256xf32> to vector<1x256xf32>
    %13 = vector.broadcast %12 : vector<1x256xf32> to vector<4x256xf32>
    %14 = arith.mulf %10, %13 : vector<4x256xf32>
    %c1_10 = arith.constant 1 : index
    %c0_11 = arith.constant 0 : index
    %c0_12 = arith.constant 0 : index
    %15 = vector.load %arg3[%c1_10, %c0_11, %c0_12] : memref<9x2x4xf32, #tpu.memory_space<vmem>>, vector<1x2x4xf32>
    %16 = vector.shape_cast %15 : vector<1x2x4xf32> to vector<2x4xf32>
    %cst_13 = arith.constant dense<0.000000e+00> : vector<2x256xf32>
    %17 = tpu.matmul %16, %14, %cst_13 {dimension_numbers = #tpu.dot_dimension_numbers<[1], [0], [0], [1], [0, 0, 1, 1], [], []>} : vector<2x4xf32>, vector<4x256xf32>, vector<2x256xf32> -> vector<2x256xf32>
    %18 = arith.addf %9, %17 : vector<2x256xf32>
    %c15_i32 = arith.constant 15 : i32
    %19 = tpu.dynamic_rotate %1 by %c15_i32 dim 1 : vector<4x256xf32>, i32 -> vector<4x256xf32>
    %c2 = arith.constant 2 : index
    %c0_14 = arith.constant 0 : index
    %c0_15 = arith.constant 0 : index
    %20 = vector.load %arg2[%c2, %c0_14, %c0_15] : memref<9x1x256xf32, #tpu.memory_space<vmem>>, vector<1x1x256xf32>
    %21 = vector.shape_cast %20 : vector<1x1x256xf32> to vector<1x256xf32>
    %22 = vector.broadcast %21 : vector<1x256xf32> to vector<4x256xf32>
    %23 = arith.mulf %19, %22 : vector<4x256xf32>
    %c2_16 = arith.constant 2 : index
    %c0_17 = arith.constant 0 : index
    %c0_18 = arith.constant 0 : index
    %24 = vector.load %arg3[%c2_16, %c0_17, %c0_18] : memref<9x2x4xf32, #tpu.memory_space<vmem>>, vector<1x2x4xf32>
    %25 = vector.shape_cast %24 : vector<1x2x4xf32> to vector<2x4xf32>
    %cst_19 = arith.constant dense<0.000000e+00> : vector<2x256xf32>
    %26 = tpu.matmul %25, %23, %cst_19 {dimension_numbers = #tpu.dot_dimension_numbers<[1], [0], [0], [1], [0, 0, 1, 1], [], []>} : vector<2x4xf32>, vector<4x256xf32>, vector<2x256xf32> -> vector<2x256xf32>
    %27 = arith.addf %18, %26 : vector<2x256xf32>
    %c1_i32 = arith.constant 1 : i32
    %28 = tpu.dynamic_rotate %1 by %c1_i32 dim 1 : vector<4x256xf32>, i32 -> vector<4x256xf32>
    %c3 = arith.constant 3 : index
    %c0_20 = arith.constant 0 : index
    %c0_21 = arith.constant 0 : index
    %29 = vector.load %arg2[%c3, %c0_20, %c0_21] : memref<9x1x256xf32, #tpu.memory_space<vmem>>, vector<1x1x256xf32>
    %30 = vector.shape_cast %29 : vector<1x1x256xf32> to vector<1x256xf32>
    %31 = vector.broadcast %30 : vector<1x256xf32> to vector<4x256xf32>
    %32 = arith.mulf %28, %31 : vector<4x256xf32>
    %c3_22 = arith.constant 3 : index
    %c0_23 = arith.constant 0 : index
    %c0_24 = arith.constant 0 : index
    %33 = vector.load %arg3[%c3_22, %c0_23, %c0_24] : memref<9x2x4xf32, #tpu.memory_space<vmem>>, vector<1x2x4xf32>
    %34 = vector.shape_cast %33 : vector<1x2x4xf32> to vector<2x4xf32>
    %cst_25 = arith.constant dense<0.000000e+00> : vector<2x256xf32>
    %35 = tpu.matmul %34, %32, %cst_25 {dimension_numbers = #tpu.dot_dimension_numbers<[1], [0], [0], [1], [0, 0, 1, 1], [], []>} : vector<2x4xf32>, vector<4x256xf32>, vector<2x256xf32> -> vector<2x256xf32>
    %36 = arith.addf %27, %35 : vector<2x256xf32>
    %c4 = arith.constant 4 : index
    %c0_26 = arith.constant 0 : index
    %c0_27 = arith.constant 0 : index
    %37 = vector.load %arg3[%c4, %c0_26, %c0_27] : memref<9x2x4xf32, #tpu.memory_space<vmem>>, vector<1x2x4xf32>
    %38 = vector.shape_cast %37 : vector<1x2x4xf32> to vector<2x4xf32>
    %cst_28 = arith.constant dense<0.000000e+00> : vector<2x256xf32>
    %39 = tpu.matmul %38, %1, %cst_28 {dimension_numbers = #tpu.dot_dimension_numbers<[1], [0], [0], [1], [0, 0, 1, 1], [], []>} : vector<2x4xf32>, vector<4x256xf32>, vector<2x256xf32> -> vector<2x256xf32>
    %40 = arith.addf %36, %39 : vector<2x256xf32>
    %c255_i32 = arith.constant 255 : i32
    %41 = tpu.dynamic_rotate %1 by %c255_i32 dim 1 : vector<4x256xf32>, i32 -> vector<4x256xf32>
    %c5 = arith.constant 5 : index
    %c0_29 = arith.constant 0 : index
    %c0_30 = arith.constant 0 : index
    %42 = vector.load %arg2[%c5, %c0_29, %c0_30] : memref<9x1x256xf32, #tpu.memory_space<vmem>>, vector<1x1x256xf32>
    %43 = vector.shape_cast %42 : vector<1x1x256xf32> to vector<1x256xf32>
    %44 = vector.broadcast %43 : vector<1x256xf32> to vector<4x256xf32>
    %45 = arith.mulf %41, %44 : vector<4x256xf32>
    %c5_31 = arith.constant 5 : index
    %c0_32 = arith.constant 0 : index
    %c0_33 = arith.constant 0 : index
    %46 = vector.load %arg3[%c5_31, %c0_32, %c0_33] : memref<9x2x4xf32, #tpu.memory_space<vmem>>, vector<1x2x4xf32>
    %47 = vector.shape_cast %46 : vector<1x2x4xf32> to vector<2x4xf32>
    %cst_34 = arith.constant dense<0.000000e+00> : vector<2x256xf32>
    %48 = tpu.matmul %47, %45, %cst_34 {dimension_numbers = #tpu.dot_dimension_numbers<[1], [0], [0], [1], [0, 0, 1, 1], [], []>} : vector<2x4xf32>, vector<4x256xf32>, vector<2x256xf32> -> vector<2x256xf32>
    %49 = arith.addf %40, %48 : vector<2x256xf32>
    %c241_i32 = arith.constant 241 : i32
    %50 = tpu.dynamic_rotate %1 by %c241_i32 dim 1 : vector<4x256xf32>, i32 -> vector<4x256xf32>
    %c6 = arith.constant 6 : index
    %c0_35 = arith.constant 0 : index
    %c0_36 = arith.constant 0 : index
    %51 = vector.load %arg2[%c6, %c0_35, %c0_36] : memref<9x1x256xf32, #tpu.memory_space<vmem>>, vector<1x1x256xf32>
    %52 = vector.shape_cast %51 : vector<1x1x256xf32> to vector<1x256xf32>
    %53 = vector.broadcast %52 : vector<1x256xf32> to vector<4x256xf32>
    %54 = arith.mulf %50, %53 : vector<4x256xf32>
    %c6_37 = arith.constant 6 : index
    %c0_38 = arith.constant 0 : index
    %c0_39 = arith.constant 0 : index
    %55 = vector.load %arg3[%c6_37, %c0_38, %c0_39] : memref<9x2x4xf32, #tpu.memory_space<vmem>>, vector<1x2x4xf32>
    %56 = vector.shape_cast %55 : vector<1x2x4xf32> to vector<2x4xf32>
    %cst_40 = arith.constant dense<0.000000e+00> : vector<2x256xf32>
    %57 = tpu.matmul %56, %54, %cst_40 {dimension_numbers = #tpu.dot_dimension_numbers<[1], [0], [0], [1], [0, 0, 1, 1], [], []>} : vector<2x4xf32>, vector<4x256xf32>, vector<2x256xf32> -> vector<2x256xf32>
    %58 = arith.addf %49, %57 : vector<2x256xf32>
    %c240_i32 = arith.constant 240 : i32
    %59 = tpu.dynamic_rotate %1 by %c240_i32 dim 1 : vector<4x256xf32>, i32 -> vector<4x256xf32>
    %c7 = arith.constant 7 : index
    %c0_41 = arith.constant 0 : index
    %c0_42 = arith.constant 0 : index
    %60 = vector.load %arg2[%c7, %c0_41, %c0_42] : memref<9x1x256xf32, #tpu.memory_space<vmem>>, vector<1x1x256xf32>
    %61 = vector.shape_cast %60 : vector<1x1x256xf32> to vector<1x256xf32>
    %62 = vector.broadcast %61 : vector<1x256xf32> to vector<4x256xf32>
    %63 = arith.mulf %59, %62 : vector<4x256xf32>
    %c7_43 = arith.constant 7 : index
    %c0_44 = arith.constant 0 : index
    %c0_45 = arith.constant 0 : index
    %64 = vector.load %arg3[%c7_43, %c0_44, %c0_45] : memref<9x2x4xf32, #tpu.memory_space<vmem>>, vector<1x2x4xf32>
    %65 = vector.shape_cast %64 : vector<1x2x4xf32> to vector<2x4xf32>
    %cst_46 = arith.constant dense<0.000000e+00> : vector<2x256xf32>
    %66 = tpu.matmul %65, %63, %cst_46 {dimension_numbers = #tpu.dot_dimension_numbers<[1], [0], [0], [1], [0, 0, 1, 1], [], []>} : vector<2x4xf32>, vector<4x256xf32>, vector<2x256xf32> -> vector<2x256xf32>
    %67 = arith.addf %58, %66 : vector<2x256xf32>
    %c239_i32 = arith.constant 239 : i32
    %68 = tpu.dynamic_rotate %1 by %c239_i32 dim 1 : vector<4x256xf32>, i32 -> vector<4x256xf32>
    %c8 = arith.constant 8 : index
    %c0_47 = arith.constant 0 : index
    %c0_48 = arith.constant 0 : index
    %69 = vector.load %arg2[%c8, %c0_47, %c0_48] : memref<9x1x256xf32, #tpu.memory_space<vmem>>, vector<1x1x256xf32>
    %70 = vector.shape_cast %69 : vector<1x1x256xf32> to vector<1x256xf32>
    %71 = vector.broadcast %70 : vector<1x256xf32> to vector<4x256xf32>
    %72 = arith.mulf %68, %71 : vector<4x256xf32>
    %c8_49 = arith.constant 8 : index
    %c0_50 = arith.constant 0 : index
    %c0_51 = arith.constant 0 : index
    %73 = vector.load %arg3[%c8_49, %c0_50, %c0_51] : memref<9x2x4xf32, #tpu.memory_space<vmem>>, vector<1x2x4xf32>
    %74 = vector.shape_cast %73 : vector<1x2x4xf32> to vector<2x4xf32>
    %cst_52 = arith.constant dense<0.000000e+00> : vector<2x256xf32>
    %75 = tpu.matmul %74, %72, %cst_52 {dimension_numbers = #tpu.dot_dimension_numbers<[1], [0], [0], [1], [0, 0, 1, 1], [], []>} : vector<2x4xf32>, vector<4x256xf32>, vector<2x256xf32> -> vector<2x256xf32>
    %76 = arith.addf %67, %75 : vector<2x256xf32>
    %c0_53 = arith.constant 0 : index
    %c0_54 = arith.constant 0 : index
    %77 = vector.load %arg4[%c0_53, %c0_54] : memref<2x1xf32, #tpu.memory_space<vmem>>, vector<2x1xf32>
    %78 = vector.broadcast %77 : vector<2x1xf32> to vector<2x256xf32>
    %79 = arith.addf %76, %78 : vector<2x256xf32>
    %cst_55 = arith.constant 0.000000e+00 : f32
    %80 = vector.broadcast %cst_55 : f32 to vector<2x256xf32>
    %81 = arith.maximumf %79, %80 : vector<2x256xf32>
    %cst_56 = arith.constant dense<0.000000e+00> : vector<2xf32>
    %82 = vector.multi_reduction <add>, %81, %cst_56 [1] : vector<2x256xf32> to vector<2xf32>
    %83 = vector.shape_cast %82 : vector<2xf32> to vector<2x1xf32>
    %cst_57 = arith.constant 3.906250e-03 : f32
    %84 = vector.broadcast %cst_57 : f32 to vector<2x1xf32>
    %85 = arith.mulf %83, %84 : vector<2x1xf32>
    %86 = vector.broadcast %85 : vector<2x1xf32> to vector<2x256xf32>
    %87 = arith.subf %81, %86 : vector<2x256xf32>
    %88 = arith.mulf %87, %87 : vector<2x256xf32>
    %cst_58 = arith.constant dense<0.000000e+00> : vector<2xf32>
    %89 = vector.multi_reduction <add>, %88, %cst_58 [1] : vector<2x256xf32> to vector<2xf32>
    %90 = vector.shape_cast %89 : vector<2xf32> to vector<2x1xf32>
    %cst_59 = arith.constant 3.906250e-03 : f32
    %91 = vector.broadcast %cst_59 : f32 to vector<2x1xf32>
    %92 = arith.mulf %90, %91 : vector<2x1xf32>
    %cst_60 = arith.constant 9.99999974E-6 : f32
    %93 = vector.broadcast %cst_60 : f32 to vector<2x1xf32>
    %94 = arith.addf %92, %93 : vector<2x1xf32>
    %95 = math.rsqrt %94 : vector<2x1xf32>
    %96 = vector.broadcast %95 : vector<2x1xf32> to vector<2x256xf32>
    %97 = arith.mulf %87, %96 : vector<2x256xf32>
    %c0_61 = arith.constant 0 : index
    %c0_62 = arith.constant 0 : index
    %98 = vector.load %arg5[%c0_61, %c0_62] : memref<2x1xf32, #tpu.memory_space<vmem>>, vector<2x1xf32>
    %99 = vector.broadcast %98 : vector<2x1xf32> to vector<2x256xf32>
    %100 = arith.mulf %97, %99 : vector<2x256xf32>
    %c0_63 = arith.constant 0 : index
    %c0_64 = arith.constant 0 : index
    %101 = vector.load %arg6[%c0_63, %c0_64] : memref<2x1xf32, #tpu.memory_space<vmem>>, vector<2x1xf32>
    %102 = vector.broadcast %101 : vector<2x1xf32> to vector<2x256xf32>
    %103 = arith.addf %100, %102 : vector<2x256xf32>
    %c17_i32_65 = arith.constant 17 : i32
    %104 = tpu.dynamic_rotate %103 by %c17_i32_65 dim 1 : vector<2x256xf32>, i32 -> vector<2x256xf32>
    %c0_66 = arith.constant 0 : index
    %c0_67 = arith.constant 0 : index
    %c0_68 = arith.constant 0 : index
    %105 = vector.load %arg2[%c0_66, %c0_67, %c0_68] : memref<9x1x256xf32, #tpu.memory_space<vmem>>, vector<1x1x256xf32>
    %106 = vector.shape_cast %105 : vector<1x1x256xf32> to vector<1x256xf32>
    %107 = vector.broadcast %106 : vector<1x256xf32> to vector<2x256xf32>
    %108 = arith.mulf %104, %107 : vector<2x256xf32>
    %c0_69 = arith.constant 0 : index
    %c0_70 = arith.constant 0 : index
    %c0_71 = arith.constant 0 : index
    %109 = vector.load %arg7[%c0_69, %c0_70, %c0_71] : memref<9x4x2xf32, #tpu.memory_space<vmem>>, vector<1x4x2xf32>
    %110 = vector.shape_cast %109 : vector<1x4x2xf32> to vector<4x2xf32>
    %cst_72 = arith.constant dense<0.000000e+00> : vector<4x256xf32>
    %111 = tpu.matmul %110, %108, %cst_72 {dimension_numbers = #tpu.dot_dimension_numbers<[1], [0], [0], [1], [0, 0, 1, 1], [], []>} : vector<4x2xf32>, vector<2x256xf32>, vector<4x256xf32> -> vector<4x256xf32>
    %c16_i32_73 = arith.constant 16 : i32
    %112 = tpu.dynamic_rotate %103 by %c16_i32_73 dim 1 : vector<2x256xf32>, i32 -> vector<2x256xf32>
    %c1_74 = arith.constant 1 : index
    %c0_75 = arith.constant 0 : index
    %c0_76 = arith.constant 0 : index
    %113 = vector.load %arg2[%c1_74, %c0_75, %c0_76] : memref<9x1x256xf32, #tpu.memory_space<vmem>>, vector<1x1x256xf32>
    %114 = vector.shape_cast %113 : vector<1x1x256xf32> to vector<1x256xf32>
    %115 = vector.broadcast %114 : vector<1x256xf32> to vector<2x256xf32>
    %116 = arith.mulf %112, %115 : vector<2x256xf32>
    %c1_77 = arith.constant 1 : index
    %c0_78 = arith.constant 0 : index
    %c0_79 = arith.constant 0 : index
    %117 = vector.load %arg7[%c1_77, %c0_78, %c0_79] : memref<9x4x2xf32, #tpu.memory_space<vmem>>, vector<1x4x2xf32>
    %118 = vector.shape_cast %117 : vector<1x4x2xf32> to vector<4x2xf32>
    %cst_80 = arith.constant dense<0.000000e+00> : vector<4x256xf32>
    %119 = tpu.matmul %118, %116, %cst_80 {dimension_numbers = #tpu.dot_dimension_numbers<[1], [0], [0], [1], [0, 0, 1, 1], [], []>} : vector<4x2xf32>, vector<2x256xf32>, vector<4x256xf32> -> vector<4x256xf32>
    %120 = arith.addf %111, %119 : vector<4x256xf32>
    %c15_i32_81 = arith.constant 15 : i32
    %121 = tpu.dynamic_rotate %103 by %c15_i32_81 dim 1 : vector<2x256xf32>, i32 -> vector<2x256xf32>
    %c2_82 = arith.constant 2 : index
    %c0_83 = arith.constant 0 : index
    %c0_84 = arith.constant 0 : index
    %122 = vector.load %arg2[%c2_82, %c0_83, %c0_84] : memref<9x1x256xf32, #tpu.memory_space<vmem>>, vector<1x1x256xf32>
    %123 = vector.shape_cast %122 : vector<1x1x256xf32> to vector<1x256xf32>
    %124 = vector.broadcast %123 : vector<1x256xf32> to vector<2x256xf32>
    %125 = arith.mulf %121, %124 : vector<2x256xf32>
    %c2_85 = arith.constant 2 : index
    %c0_86 = arith.constant 0 : index
    %c0_87 = arith.constant 0 : index
    %126 = vector.load %arg7[%c2_85, %c0_86, %c0_87] : memref<9x4x2xf32, #tpu.memory_space<vmem>>, vector<1x4x2xf32>
    %127 = vector.shape_cast %126 : vector<1x4x2xf32> to vector<4x2xf32>
    %cst_88 = arith.constant dense<0.000000e+00> : vector<4x256xf32>
    %128 = tpu.matmul %127, %125, %cst_88 {dimension_numbers = #tpu.dot_dimension_numbers<[1], [0], [0], [1], [0, 0, 1, 1], [], []>} : vector<4x2xf32>, vector<2x256xf32>, vector<4x256xf32> -> vector<4x256xf32>
    %129 = arith.addf %120, %128 : vector<4x256xf32>
    %c1_i32_89 = arith.constant 1 : i32
    %130 = tpu.dynamic_rotate %103 by %c1_i32_89 dim 1 : vector<2x256xf32>, i32 -> vector<2x256xf32>
    %c3_90 = arith.constant 3 : index
    %c0_91 = arith.constant 0 : index
    %c0_92 = arith.constant 0 : index
    %131 = vector.load %arg2[%c3_90, %c0_91, %c0_92] : memref<9x1x256xf32, #tpu.memory_space<vmem>>, vector<1x1x256xf32>
    %132 = vector.shape_cast %131 : vector<1x1x256xf32> to vector<1x256xf32>
    %133 = vector.broadcast %132 : vector<1x256xf32> to vector<2x256xf32>
    %134 = arith.mulf %130, %133 : vector<2x256xf32>
    %c3_93 = arith.constant 3 : index
    %c0_94 = arith.constant 0 : index
    %c0_95 = arith.constant 0 : index
    %135 = vector.load %arg7[%c3_93, %c0_94, %c0_95] : memref<9x4x2xf32, #tpu.memory_space<vmem>>, vector<1x4x2xf32>
    %136 = vector.shape_cast %135 : vector<1x4x2xf32> to vector<4x2xf32>
    %cst_96 = arith.constant dense<0.000000e+00> : vector<4x256xf32>
    %137 = tpu.matmul %136, %134, %cst_96 {dimension_numbers = #tpu.dot_dimension_numbers<[1], [0], [0], [1], [0, 0, 1, 1], [], []>} : vector<4x2xf32>, vector<2x256xf32>, vector<4x256xf32> -> vector<4x256xf32>
    %138 = arith.addf %129, %137 : vector<4x256xf32>
    %c4_97 = arith.constant 4 : index
    %c0_98 = arith.constant 0 : index
    %c0_99 = arith.constant 0 : index
    %139 = vector.load %arg7[%c4_97, %c0_98, %c0_99] : memref<9x4x2xf32, #tpu.memory_space<vmem>>, vector<1x4x2xf32>
    %140 = vector.shape_cast %139 : vector<1x4x2xf32> to vector<4x2xf32>
    %cst_100 = arith.constant dense<0.000000e+00> : vector<4x256xf32>
    %141 = tpu.matmul %140, %103, %cst_100 {dimension_numbers = #tpu.dot_dimension_numbers<[1], [0], [0], [1], [0, 0, 1, 1], [], []>} : vector<4x2xf32>, vector<2x256xf32>, vector<4x256xf32> -> vector<4x256xf32>
    %142 = arith.addf %138, %141 : vector<4x256xf32>
    %c255_i32_101 = arith.constant 255 : i32
    %143 = tpu.dynamic_rotate %103 by %c255_i32_101 dim 1 : vector<2x256xf32>, i32 -> vector<2x256xf32>
    %c5_102 = arith.constant 5 : index
    %c0_103 = arith.constant 0 : index
    %c0_104 = arith.constant 0 : index
    %144 = vector.load %arg2[%c5_102, %c0_103, %c0_104] : memref<9x1x256xf32, #tpu.memory_space<vmem>>, vector<1x1x256xf32>
    %145 = vector.shape_cast %144 : vector<1x1x256xf32> to vector<1x256xf32>
    %146 = vector.broadcast %145 : vector<1x256xf32> to vector<2x256xf32>
    %147 = arith.mulf %143, %146 : vector<2x256xf32>
    %c5_105 = arith.constant 5 : index
    %c0_106 = arith.constant 0 : index
    %c0_107 = arith.constant 0 : index
    %148 = vector.load %arg7[%c5_105, %c0_106, %c0_107] : memref<9x4x2xf32, #tpu.memory_space<vmem>>, vector<1x4x2xf32>
    %149 = vector.shape_cast %148 : vector<1x4x2xf32> to vector<4x2xf32>
    %cst_108 = arith.constant dense<0.000000e+00> : vector<4x256xf32>
    %150 = tpu.matmul %149, %147, %cst_108 {dimension_numbers = #tpu.dot_dimension_numbers<[1], [0], [0], [1], [0, 0, 1, 1], [], []>} : vector<4x2xf32>, vector<2x256xf32>, vector<4x256xf32> -> vector<4x256xf32>
    %151 = arith.addf %142, %150 : vector<4x256xf32>
    %c241_i32_109 = arith.constant 241 : i32
    %152 = tpu.dynamic_rotate %103 by %c241_i32_109 dim 1 : vector<2x256xf32>, i32 -> vector<2x256xf32>
    %c6_110 = arith.constant 6 : index
    %c0_111 = arith.constant 0 : index
    %c0_112 = arith.constant 0 : index
    %153 = vector.load %arg2[%c6_110, %c0_111, %c0_112] : memref<9x1x256xf32, #tpu.memory_space<vmem>>, vector<1x1x256xf32>
    %154 = vector.shape_cast %153 : vector<1x1x256xf32> to vector<1x256xf32>
    %155 = vector.broadcast %154 : vector<1x256xf32> to vector<2x256xf32>
    %156 = arith.mulf %152, %155 : vector<2x256xf32>
    %c6_113 = arith.constant 6 : index
    %c0_114 = arith.constant 0 : index
    %c0_115 = arith.constant 0 : index
    %157 = vector.load %arg7[%c6_113, %c0_114, %c0_115] : memref<9x4x2xf32, #tpu.memory_space<vmem>>, vector<1x4x2xf32>
    %158 = vector.shape_cast %157 : vector<1x4x2xf32> to vector<4x2xf32>
    %cst_116 = arith.constant dense<0.000000e+00> : vector<4x256xf32>
    %159 = tpu.matmul %158, %156, %cst_116 {dimension_numbers = #tpu.dot_dimension_numbers<[1], [0], [0], [1], [0, 0, 1, 1], [], []>} : vector<4x2xf32>, vector<2x256xf32>, vector<4x256xf32> -> vector<4x256xf32>
    %160 = arith.addf %151, %159 : vector<4x256xf32>
    %c240_i32_117 = arith.constant 240 : i32
    %161 = tpu.dynamic_rotate %103 by %c240_i32_117 dim 1 : vector<2x256xf32>, i32 -> vector<2x256xf32>
    %c7_118 = arith.constant 7 : index
    %c0_119 = arith.constant 0 : index
    %c0_120 = arith.constant 0 : index
    %162 = vector.load %arg2[%c7_118, %c0_119, %c0_120] : memref<9x1x256xf32, #tpu.memory_space<vmem>>, vector<1x1x256xf32>
    %163 = vector.shape_cast %162 : vector<1x1x256xf32> to vector<1x256xf32>
    %164 = vector.broadcast %163 : vector<1x256xf32> to vector<2x256xf32>
    %165 = arith.mulf %161, %164 : vector<2x256xf32>
    %c7_121 = arith.constant 7 : index
    %c0_122 = arith.constant 0 : index
    %c0_123 = arith.constant 0 : index
    %166 = vector.load %arg7[%c7_121, %c0_122, %c0_123] : memref<9x4x2xf32, #tpu.memory_space<vmem>>, vector<1x4x2xf32>
    %167 = vector.shape_cast %166 : vector<1x4x2xf32> to vector<4x2xf32>
    %cst_124 = arith.constant dense<0.000000e+00> : vector<4x256xf32>
    %168 = tpu.matmul %167, %165, %cst_124 {dimension_numbers = #tpu.dot_dimension_numbers<[1], [0], [0], [1], [0, 0, 1, 1], [], []>} : vector<4x2xf32>, vector<2x256xf32>, vector<4x256xf32> -> vector<4x256xf32>
    %169 = arith.addf %160, %168 : vector<4x256xf32>
    %c239_i32_125 = arith.constant 239 : i32
    %170 = tpu.dynamic_rotate %103 by %c239_i32_125 dim 1 : vector<2x256xf32>, i32 -> vector<2x256xf32>
    %c8_126 = arith.constant 8 : index
    %c0_127 = arith.constant 0 : index
    %c0_128 = arith.constant 0 : index
    %171 = vector.load %arg2[%c8_126, %c0_127, %c0_128] : memref<9x1x256xf32, #tpu.memory_space<vmem>>, vector<1x1x256xf32>
    %172 = vector.shape_cast %171 : vector<1x1x256xf32> to vector<1x256xf32>
    %173 = vector.broadcast %172 : vector<1x256xf32> to vector<2x256xf32>
    %174 = arith.mulf %170, %173 : vector<2x256xf32>
    %c8_129 = arith.constant 8 : index
    %c0_130 = arith.constant 0 : index
    %c0_131 = arith.constant 0 : index
    %175 = vector.load %arg7[%c8_129, %c0_130, %c0_131] : memref<9x4x2xf32, #tpu.memory_space<vmem>>, vector<1x4x2xf32>
    %176 = vector.shape_cast %175 : vector<1x4x2xf32> to vector<4x2xf32>
    %cst_132 = arith.constant dense<0.000000e+00> : vector<4x256xf32>
    %177 = tpu.matmul %176, %174, %cst_132 {dimension_numbers = #tpu.dot_dimension_numbers<[1], [0], [0], [1], [0, 0, 1, 1], [], []>} : vector<4x2xf32>, vector<2x256xf32>, vector<4x256xf32> -> vector<4x256xf32>
    %178 = arith.addf %169, %177 : vector<4x256xf32>
    %c0_133 = arith.constant 0 : index
    %c0_134 = arith.constant 0 : index
    %179 = vector.load %arg8[%c0_133, %c0_134] : memref<4x1xf32, #tpu.memory_space<vmem>>, vector<4x1xf32>
    %180 = vector.broadcast %179 : vector<4x1xf32> to vector<4x256xf32>
    %181 = arith.addf %178, %180 : vector<4x256xf32>
    %cst_135 = arith.constant 0.000000e+00 : f32
    %182 = vector.broadcast %cst_135 : f32 to vector<4x256xf32>
    %183 = arith.maximumf %181, %182 : vector<4x256xf32>
    %cst_136 = arith.constant dense<0.000000e+00> : vector<4xf32>
    %184 = vector.multi_reduction <add>, %183, %cst_136 [1] : vector<4x256xf32> to vector<4xf32>
    %185 = vector.shape_cast %184 : vector<4xf32> to vector<4x1xf32>
    %cst_137 = arith.constant 3.906250e-03 : f32
    %186 = vector.broadcast %cst_137 : f32 to vector<4x1xf32>
    %187 = arith.mulf %185, %186 : vector<4x1xf32>
    %188 = vector.broadcast %187 : vector<4x1xf32> to vector<4x256xf32>
    %189 = arith.subf %183, %188 : vector<4x256xf32>
    %190 = arith.mulf %189, %189 : vector<4x256xf32>
    %cst_138 = arith.constant dense<0.000000e+00> : vector<4xf32>
    %191 = vector.multi_reduction <add>, %190, %cst_138 [1] : vector<4x256xf32> to vector<4xf32>
    %192 = vector.shape_cast %191 : vector<4xf32> to vector<4x1xf32>
    %cst_139 = arith.constant 3.906250e-03 : f32
    %193 = vector.broadcast %cst_139 : f32 to vector<4x1xf32>
    %194 = arith.mulf %192, %193 : vector<4x1xf32>
    %cst_140 = arith.constant 9.99999974E-6 : f32
    %195 = vector.broadcast %cst_140 : f32 to vector<4x1xf32>
    %196 = arith.addf %194, %195 : vector<4x1xf32>
    %197 = math.rsqrt %196 : vector<4x1xf32>
    %198 = vector.broadcast %197 : vector<4x1xf32> to vector<4x256xf32>
    %199 = arith.mulf %189, %198 : vector<4x256xf32>
    %c0_141 = arith.constant 0 : index
    %c0_142 = arith.constant 0 : index
    %200 = vector.load %arg9[%c0_141, %c0_142] : memref<4x1xf32, #tpu.memory_space<vmem>>, vector<4x1xf32>
    %201 = vector.broadcast %200 : vector<4x1xf32> to vector<4x256xf32>
    %202 = arith.mulf %199, %201 : vector<4x256xf32>
    %c0_143 = arith.constant 0 : index
    %c0_144 = arith.constant 0 : index
    %203 = vector.load %arg10[%c0_143, %c0_144] : memref<4x1xf32, #tpu.memory_space<vmem>>, vector<4x1xf32>
    %204 = vector.broadcast %203 : vector<4x1xf32> to vector<4x256xf32>
    %205 = arith.addf %202, %204 : vector<4x256xf32>
    %c0_145 = arith.constant 0 : index
    %c0_146 = arith.constant 0 : index
    %c0_147 = arith.constant 0 : index
    %206 = vector.load %arg11[%c0_145, %c0_146, %c0_147] : memref<1x4x256xf32, #tpu.memory_space<vmem>>, vector<1x4x256xf32>
    %207 = vector.shape_cast %206 : vector<1x4x256xf32> to vector<4x256xf32>
    %208 = vector.shape_cast %205 : vector<4x256xf32> to vector<1x4x256xf32>
    tpu.vector_store %arg11[%c0_145, %c0_146, %c0_147], %208 {strides = array<i32>} : memref<1x4x256xf32, #tpu.memory_space<vmem>>, vector<1x4x256xf32>,
    return
  }
  func.func @transform_0(%arg0: i32) -> (i32, i32, i32) {
    %c0_i32 = arith.constant 0 : i32
    %c0_i32_0 = arith.constant 0 : i32
    %c0_i32_1 = arith.constant 0 : i32
    return %arg0, %c0_i32, %c0_i32_0 : i32, i32, i32
  }
  func.func @transform_1(%arg0: i32) -> (i32, i32, i32) {
    %c0_i32 = arith.constant 0 : i32
    %c0_i32_0 = arith.constant 0 : i32
    %c0_i32_1 = arith.constant 0 : i32
    %c0_i32_2 = arith.constant 0 : i32
    return %c0_i32, %c0_i32_0, %c0_i32_1 : i32, i32, i32
  }
  func.func @transform_2(%arg0: i32) -> (i32, i32, i32) {
    %c0_i32 = arith.constant 0 : i32
    %c0_i32_0 = arith.constant 0 : i32
    %c0_i32_1 = arith.constant 0 : i32
    %c0_i32_2 = arith.constant 0 : i32
    return %c0_i32, %c0_i32_0, %c0_i32_1 : i32, i32, i32
  }
  func.func @transform_3(%arg0: i32) -> (i32, i32) {
    %c0_i32 = arith.constant 0 : i32
    %c0_i32_0 = arith.constant 0 : i32
    %c0_i32_1 = arith.constant 0 : i32
    return %c0_i32, %c0_i32_0 : i32, i32
  }
  func.func @transform_4(%arg0: i32) -> (i32, i32) {
    %c0_i32 = arith.constant 0 : i32
    %c0_i32_0 = arith.constant 0 : i32
    %c0_i32_1 = arith.constant 0 : i32
    return %c0_i32, %c0_i32_0 : i32, i32
  }
  func.func @transform_5(%arg0: i32) -> (i32, i32) {
    %c0_i32 = arith.constant 0 : i32
    %c0_i32_0 = arith.constant 0 : i32
    %c0_i32_1 = arith.constant 0 : i32
    return %c0_i32, %c0_i32_0 : i32, i32
  }
  func.func @transform_6(%arg0: i32) -> (i32, i32, i32) {
    %c0_i32 = arith.constant 0 : i32
    %c0_i32_0 = arith.constant 0 : i32
    %c0_i32_1 = arith.constant 0 : i32
    %c0_i32_2 = arith.constant 0 : i32
    return %c0_i32, %c0_i32_0, %c0_i32_1 : i32, i32, i32
  }
  func.func @transform_7(%arg0: i32) -> (i32, i32) {
    %c0_i32 = arith.constant 0 : i32
    %c0_i32_0 = arith.constant 0 : i32
    %c0_i32_1 = arith.constant 0 : i32
    return %c0_i32, %c0_i32_0 : i32, i32
  }
  func.func @transform_8(%arg0: i32) -> (i32, i32) {
    %c0_i32 = arith.constant 0 : i32
    %c0_i32_0 = arith.constant 0 : i32
    %c0_i32_1 = arith.constant 0 : i32
    return %c0_i32, %c0_i32_0 : i32, i32
  }
  func.func @transform_9(%arg0: i32) -> (i32, i32) {
    %c0_i32 = arith.constant 0 : i32
    %c0_i32_0 = arith.constant 0 : i32
    %c0_i32_1 = arith.constant 0 : i32
    return %c0_i32, %c0_i32_0 : i32, i32
  }
  func.func @transform_10(%arg0: i32) -> (i32, i32, i32) {
    %c0_i32 = arith.constant 0 : i32
    %c0_i32_0 = arith.constant 0 : i32
    %c0_i32_1 = arith.constant 0 : i32
    return %arg0, %c0_i32, %c0_i32_0 : i32, i32, i32
  }
}

</mosaic_0001>

<bundles_post_ra>
// kernel: forward.1
= control target key start
LH: loop header
LB: loop body
LE: loop exit
PB: predicated region body
PF: predicated region fallthrough
CT: control target
= control target key end

     0   :  { %s2481_s13 = smov 0   ;;  %s2906_s0 = inlined_call_operand.vmem [shape: f32[2,4,256], index: 0, kind: input, shape index: {}]   ;;  %s2907_s1 = inlined_call_operand.vmem [shape: f32[9,1,256], index: 1, kind: input, shape index: {}]   ;;  %s2908_s2 = inlined_call_operand.vmem [shape: f32[9,2,4], index: 2, kind: input, shape index: {}]   ;;  %s2909_s3 = inlined_call_operand.vmem [shape: f32[2,1], index: 3, kind: input, shape index: {}, may-alias: {3,5}]   ;;  %s2910_s4 = inlined_call_operand.vmem [shape: f32[2,1], index: 4, kind: input, shape index: {}]   ;;  %s2911_s5 = inlined_call_operand.vmem [shape: f32[2,1], index: 5, kind: input, shape index: {}, may-alias: {3,5}]   ;;  %s2912_s6 = inlined_call_operand.vmem [shape: f32[9,4,2], index: 6, kind: input, shape index: {}]   ;;  %s2913_s7 = inlined_call_operand.vmem [shape: f32[4,1], index: 7, kind: input, shape index: {}, may-alias: {7,9}]   ;;  %s2914_s8 = inlined_call_operand.vmem [shape: f32[4,1], index: 8, kind: input, shape index: {}]   ;;  %s2915_s9 = inlined_call_operand.vmem [shape: f32[4,1], index: 9, kind: input, shape index: {}, may-alias: {7,9}]   ;;  %s2916_s10 = inlined_call_operand.vmem [shape: f32[2,4,256], index: 10, kind: output, shape index: {}]  }
   0x1 LB: > { %s2261_s14 = sadd.s32 4294967295, %s2414_s13   ;;  %p2265_p0 = scmp.ge.s32.totalorder %s2414_s13, 1  ;;  %s2414_s13 = sphi %s2481_s13, %s20_s13  }
   0x2   : > { %p312_p1 = scmp.lt.s32.totalorder %s2414_s13, 3 }
   0x4   : > { %p313_p2 = pnand %p2265_p0, %p312_p1 }
   0x5   : > { %p350_p3 = scmp.lt.s32.totalorder (!%p313_p2), %s2261_s14, 1  ;;  %v2416_v0 = vmov (!%p313_p2), 0.0   ;;  %s2417_s19 = smov (!%p313_p2), 17   ;;  %v1292_v3 = vld [vmem:[%s2909_s3] sm:$0x3] (!%p313_p2)  ;;  %v2425_v4 = vmov (!%p313_p2), 0   ;;  %v368_v5 = vlaneseq (!%p313_p2) }
   0x6   : > { %316 = sbr.rel (%p313_p2) target bundleno = 1464 (0x5b8), region = 60  ;;  %487 = vmatprep.mubr.f32.mxu0 (!%p313_p2), %v2416_v0  ;;  %1432 = vmatprep.mubr.f32.mxu1 (!%p313_p2), %v2416_v0  ;;  %s2418_s20 = smov (!%p313_p2), 16   ;;  %v373_v10 = vld [vmem:[%s2907_s1] sm:$0x3] (!%p313_p2)  ;;  %v2270_v11 = vld [vmem:[%s2907_s1 + $0x2] sm:$0x3] (!%p313_p2) }
   0x7   : > { %s2419_s21 = smov (!%p313_p2), 15   ;;  %s2420_s22 = smov (!%p313_p2), 1   ;;  %2401 = vset.pattern.permute.xlu0 (!%p313_p2), %v2425_v4  ;;  %2402 = vset.pattern.permute.xlu1 (!%p313_p2), %v2425_v4  ;;  %v376_v6 = vshrl.u32 (!%p313_p2), %v368_v5, 7  ;;  %v2540_v7 = vand.u32 (!%p313_p2), 127, %v368_v5  ;;  %v2278_v18 = vld [vmem:[%s2907_s1 + $0x4] sm:$0x3] (!%p313_p2) }
   0x8   : > { %s2421_s23 = smov (!%p313_p2), 127   ;;  %s2422_s24 = smov (!%p313_p2), 113   ;;  %vm416_vm2 = vcmask (!%p313_p2), 1043456   ;;  %v2271_v30 = vld [vmem:[%s2908_s2 + $0x2] sm:$0x3] (!%p313_p2)  ;;  %vm412_vm4 = vcmask (!%p313_p2), 31744  }
   0x9   : > { %s2423_s25 = smov (!%p313_p2), 112   ;;  %s2424_s26 = smov (!%p313_p2), 111   ;;  %v2542_v8 = vsub.s32 (!%p313_p2), 0, %v376_v6  ;;  %v2544_v9 = vsub.s32 (!%p313_p2), 1, %v376_v6  ;;  %vm370_vm0 = vcmp.lt.s32.totalorder (!%p313_p2), %v2540_v7, 17  ;;  %vm392_vm1 = vcmp.lt.s32.totalorder (!%p313_p2), %v2540_v7, 16 }
   0xa   : > { %vm578_vm3 = vcmp.lt.s32.totalorder (!%p313_p2), %v2540_v7, 15  ;;  %v2283_v34 = vld [vmem:[%s2907_s1 + $0x6] sm:$0x3] (!%p313_p2)  ;;  %vm684_vm5 = vcmp.lt.s32.totalorder (!%p313_p2), %v2540_v7, 1  ;;  %v387_v43 = vld [vmem:[%s2908_s2] sm:$0x3] (!%p313_p2) }
   0xb   : > { %v2554_v14 = vrot.slane (!%p313_p2), %v373_v10, %v2544_v9  ;;  %v2558_v15 = vrot.slane (!%p313_p2), %v2270_v11, %v2542_v8  ;;  %v2561_v16 = vrot.slane (!%p313_p2), %v2270_v11, %v2544_v9  ;;  %v2564_v17 = vrot.slane (!%p313_p2), %v373_v10, %v2542_v8  ;;  %v2279_v48 = vld [vmem:[%s2908_s2 + $0x4] sm:$0x3] (!%p313_p2)  ;;  %v2292_v49 = vld [vmem:[%s2907_s1 + $0xa] sm:$0x3] (!%p313_p2)  ;;  %v2284_v54 = vld [vmem:[%s2908_s2 + $0x6] sm:$0x3] (!%p313_p2) }
   0xc   : > { %v2582_v28 = vrot.slane (!%p313_p2), %v2278_v18, %v2544_v9  ;;  %v2601_v36 = vrot.slane (!%p313_p2), %v2278_v18, %v2542_v8  ;;  %v2608_v39 = vrot.slane (!%p313_p2), %v2283_v34, %v2544_v9  ;;  %v2620_v45 = vrot.slane (!%p313_p2), %v2283_v34, %v2542_v8  ;;  %v2297_v56 = vld [vmem:[%s2907_s1 + $0xc] sm:$0x3] (!%p313_p2)  ;;  %v2293_v18 = vld [vmem:[%s2908_s2 + $0xa] sm:$0x3] (!%p313_p2) }
   0xd   : > { %s2918_s14 = smov (!%p350_p3, %s2261_s14), 1  ;;  %vm872_vm6 = vcmp.lt.s32.totalorder %v2540_v7, 127  ;;  %v2640_v52 = vrot.slane %v2292_v49, %v2544_v9  ;;  %vm978_vm7 = vcmp.lt.s32.totalorder %v2540_v7, 113  ;;  %v2656_v59 = vrot.slane %v2292_v49, %v2542_v8 }
   0xe   : > { %s2349_s15 = sshll.u32 %s2918_s14, 3  ;;  %v2663_v61 = vrot.slane %v2297_v56, %v2544_v9  ;;  %vm1084_vm8 = vcmp.lt.s32.totalorder %v2540_v7, 112  ;;  %v2679_v6 = vrot.slane %v2297_v56, %v2542_v8  ;;  %vm1190_vm9 = vcmp.lt.s32.totalorder %v2540_v7, 111 }
   0xf   : > { %s354_s18 = scalar_lea.vmem %s2906_s0, %s2349_s15  ;;  %vm1302_vm10 = vcmask 1041408   ;;  %vm1358_vm11 = vcmask 15360   ;;  %s359_s12 = scalar_lea.vmem %s2916_s10, %s2349_s15 }
  0x10   : > { %v2499_v1 = vld [vmem:[%s354_s18] sm:$0xff] }
  0x11   : > { %364 = vrot.lane.b32.xlu1 %v2499_v1, %s2417_s19  ;;  %388 = vrot.lane.b32.xlu0 %v2499_v1, %s2418_s20  ;;  %v2507_v2 = vcombine.high %v2499_v1, %v2499_v1 }
  0x15   : > { %366 = vrot.lane.b32.xlu1 %v2507_v2, %s2417_s19  ;;  %390 = vrot.lane.b32.xlu0 %v2507_v2, %s2418_s20 }
  0x19   : > { %576 = vrot.lane.b32.xlu1 %v2507_v2, %s2419_s21  ;;  %574 = vrot.lane.b32.xlu0 %v2499_v1, %s2419_s21 }
  0x1d   : > { %682 = vrot.lane.b32.xlu1 %v2507_v2, %s2420_s22  ;;  %680 = vrot.lane.b32.xlu0 %v2499_v1, %s2420_s22 }
  0x21   : > { %870 = vrot.lane.b32.xlu1 %v2507_v2, %s2421_s23  ;;  %868 = vrot.lane.b32.xlu0 %v2499_v1, %s2421_s23 }
  0x25   : > { %976 = vrot.lane.b32.xlu1 %v2507_v2, %s2422_s24  ;;  %974 = vrot.lane.b32.xlu0 %v2499_v1, %s2422_s24 }
  0x29   : > { %1082 = vrot.lane.b32.xlu1 %v2507_v2, %s2423_s25  ;;  %1080 = vrot.lane.b32.xlu0 %v2499_v1, %s2423_s25 }
  0x2d   : > { %1188 = vrot.lane.b32.xlu1 %v2507_v2, %s2424_s26  ;;  %1186 = vrot.lane.b32.xlu0 %v2499_v1, %s2424_s26 }
  0x31   : > { %1295 = vperm.xlu0 %2401, %v1292_v3   ;;  %v2302_v3 = vld [vmem:[%s2907_s1 + $0xe] sm:$0x3] }
  0x32   : > { %v2686_v11 = vrot.slane %v2302_v3, %v2544_v9 }
  0x83   : > { %v365_v12 = vpop.permute.xlu1 %364  ;;  %v389_v13 = vpop.permute.xlu0 %388 }
  0x87   : > { %v367_v19 = vpop.permute.xlu1 %366  ;;  %v391_v20 = vpop.permute.xlu0 %390 }
  0x88   : > { %v371_v21 = vsel %vm370_vm0, %v365_v12, %v367_v19  ;;  %v372_v22 = vsel %vm370_vm0, %v367_v19, %v365_v12  ;;  %v393_v23 = vsel %vm392_vm1, %v389_v13, %v391_v20  ;;  %v394_v24 = vsel %vm392_vm1, %v391_v20, %v389_v13  ;;  %v2307_v20 = vld [vmem:[%s2907_s1 + $0x10] sm:$0x3] }
  0x89   : > { %v386_v25 = vmul.f32 %v2554_v14, %v371_v21  ;;  %v408_v26 = vmul.f32 %v2558_v15, %v394_v24  ;;  %v409_v27 = vmul.f32 %v2561_v16, %v393_v23  ;;  %v385_v29 = vmul.f32 %v2564_v17, %v372_v22 }
  0x8a   : > { %v2702_v23 = vrot.slane %v2302_v3, %v2542_v8 }
  0x8b   : > { %2272 = vmatprep.subr.msk.mxu0 %vm416_vm2, %v409_v27  ;;  %v577_v31 = vpop.permute.xlu1 %576  ;;  %v575_v32 = vpop.permute.xlu0 %574 }
  0x8c   : > { %2273 = vmatpush1.msk.msra.mxu0 %vm416_vm2, %v408_v26  ;;  %v579_v33 = vsel %vm578_vm3, %v575_v32, %v577_v31  ;;  %v580_v37 = vsel %vm578_vm3, %v577_v31, %v575_v32  ;;  %v2721_v31 = vrot.slane %v2307_v20, %v2542_v8  ;;  %v2308_v8 = vld [vmem:[%s2908_s2 + $0x10] sm:$0x3] }
  0x8d   : > { %2274 = vmatmul.mubr.msk.f32.vlgmr.msra.gmra.mrb[0].mxu0 %vm412_vm4, %v2271_v30  ;;  %2275 = vmatprep.subr.msk.mxu0 %vm416_vm2, %v386_v25  ;;  %v595_v35 = vmul.f32 %v2582_v28, %v579_v33  ;;  %v594_v42 = vmul.f32 %v2601_v36, %v580_v37  ;;  %v2709_v25 = vrot.slane %v2307_v20, %v2544_v9  ;;  %v2303_v33 = vld [vmem:[%s2908_s2 + $0xe] sm:$0x3] }
  0x8e   : > { %2276 = vmatpush1.msk.msra.mxu0 %vm416_vm2, %v385_v29  ;;  %567 = vmatprep.mubr.f32.mxu0 %v2416_v0  ;;  %v2298_v29 = vld [vmem:[%s2908_s2 + $0xc] sm:$0x3] }
  0x8f   : > { %2280 = vmatprep.subr.msk.mxu0 %vm416_vm2, %v595_v35  ;;  %v683_v38 = vpop.permute.xlu1 %682  ;;  %v681_v40 = vpop.permute.xlu0 %680 }
  0x90   : > { %v685_v41 = vsel %vm684_vm5, %v681_v40, %v683_v38  ;;  %v686_v46 = vsel %vm684_vm5, %v683_v38, %v681_v40 }
  0x91   : > { %v701_v44 = vmul.f32 %v2608_v39, %v685_v41  ;;  %v700_v47 = vmul.f32 %v2620_v45, %v686_v46 }
  0x93   : > { %v871_v50 = vpop.permute.xlu1 %870  ;;  %v869_v51 = vpop.permute.xlu0 %868 }
  0x94   : > { %v874_v53 = vsel %vm872_vm6, %v871_v50, %v869_v51  ;;  %v873_v60 = vsel %vm872_vm6, %v869_v51, %v871_v50 }
  0x95   : > { %2277 = vmatmul.mubr.msk.f32.vlgmr.msra.gmra.mrb[0].mxu0 %vm412_vm4, %v387_v43  ;;  %v889_v55 = vmul.f32 %v2640_v52, %v874_v53  ;;  %v888_v63 = vmul.f32 %v2656_v59, %v873_v60 }
  0x96   : > { %2281 = vmatpush1.msk.msra.mxu0 %vm416_vm2, %v594_v42  ;;  %671 = vmatprep.mubr.f32.mxu0 %v2416_v0 }
  0x97   : > { %2285 = vmatprep.subr.msk.mxu0 %vm416_vm2, %v701_v44  ;;  %v977_v57 = vpop.permute.xlu1 %976  ;;  %v975_v58 = vpop.permute.xlu0 %974 }
  0x98   : > { %v980_v62 = vsel %vm978_vm7, %v977_v57, %v975_v58  ;;  %v979_v10 = vsel %vm978_vm7, %v975_v58, %v977_v57  ;;  %v1331_v58 = vld [vmem:[%s2911_s5] sm:$0x3] }
  0x99   : > { %v994_v13 = vmul.f32 %v2679_v6, %v979_v10 }
  0x9b   : > { %v1083_v4 = vpop.permute.xlu1 %1082  ;;  %v1081_v5 = vpop.permute.xlu0 %1080 }
  0x9c   : > { %v1086_v12 = vsel %vm1084_vm8, %v1083_v4, %v1081_v5  ;;  %v1085_v24 = vsel %vm1084_vm8, %v1081_v5, %v1083_v4 }
  0x9d   : > { %2282 = vmatmul.mubr.msk.f32.vlgmr.msra.gmra.mrb[0].mxu0 %vm412_vm4, %v2279_v48  ;;  %v1101_v19 = vmul.f32 %v2686_v11, %v1086_v12  ;;  %v1100_v27 = vmul.f32 %v2702_v23, %v1085_v24 }
  0x9e   : > { %2286 = vmatpush1.msk.msra.mxu0 %vm416_vm2, %v700_v47  ;;  %777 = vmatprep.mubr.f32.mxu0 %v2416_v0  ;;  %v1323_v47 = vld [vmem:[%s2910_s4] sm:$0x3] }
  0x9f   : > { %2289 = vmatprep.subr.msk.mxu0 %vm416_vm2, %v2507_v2  ;;  %v995_v2 = vmul.f32 %v2663_v61, %v980_v62  ;;  %v1189_v21 = vpop.permute.xlu1 %1188  ;;  %v1187_v22 = vpop.permute.xlu0 %1186 }
  0xa0   : > { %v1192_v26 = vsel %vm1190_vm9, %v1189_v21, %v1187_v22  ;;  %v1191_v9 = vsel %vm1190_vm9, %v1187_v22, %v1189_v21 }
  0xa1   : > { %v1207_v30 = vmul.f32 %v2709_v25, %v1192_v26  ;;  %v1206_v32 = vmul.f32 %v2721_v31, %v1191_v9 }
  0xa5   : > { %2287 = vmatmul.mubr.msk.f32.vlgmr.msra.gmra.mrb[0].mxu0 %vm412_vm4, %v2284_v54 }
  0xa6   : > { %2290 = vmatpush1.msk.msra.mxu0 %vm416_vm2, %v2499_v1  ;;  %859 = vmatprep.mubr.f32.mxu0 %v2416_v0  ;;  %v2288_v1 = vld [vmem:[%s2908_s2 + $0x8] sm:$0x3] }
  0xa7   : > { %2294 = vmatprep.subr.msk.mxu0 %vm416_vm2, %v889_v55 }
  0xad   : > { %2291 = vmatmul.mubr.msk.f32.vlgmr.msra.gmra.mrb[0].mxu0 %vm412_vm4, %v2288_v1 }
  0xae   : > { %2295 = vmatpush1.msk.msra.mxu0 %vm416_vm2, %v888_v63  ;;  %965 = vmatprep.mubr.f32.mxu0 %v2416_v0 }
  0xaf   : > { %2299 = vmatprep.subr.msk.mxu0 %vm416_vm2, %v995_v2 }
  0xb0   : > { %v1296_v34 = vpop.permute.xlu0 %1295 }
  0xb5   : > { %2296 = vmatmul.mubr.msk.f32.vlgmr.msra.gmra.mrb[0].mxu0 %vm412_vm4, %v2293_v18 }
  0xb6   : > { %2300 = vmatpush1.msk.msra.mxu0 %vm416_vm2, %v994_v13  ;;  %1071 = vmatprep.mubr.f32.mxu0 %v2416_v0 }
  0xb7   : > { %2304 = vmatprep.subr.msk.mxu0 %vm416_vm2, %v1101_v19  ;;  %v2155_v19 = vld [vmem:[%s2913_s7] sm:$0xf] }
  0xbd   : > { %2301 = vmatmul.mubr.msk.f32.vlgmr.msra.gmra.mrb[0].mxu0 %vm412_vm4, %v2298_v29 }
  0xbe   : > { %2305 = vmatpush1.msk.msra.mxu0 %vm416_vm2, %v1100_v27  ;;  %1177 = vmatprep.mubr.f32.mxu0 %v2416_v0 }
  0xbf   : > { %2309 = vmatprep.subr.msk.mxu0 %vm416_vm2, %v1207_v30  ;;  %v2312_v30 = vld [vmem:[%s2912_s6 + $0x4] sm:$0xf] }
  0xc5   : > { %2306 = vmatmul.mubr.msk.f32.vlgmr.msra.gmra.mrb[0].mxu0 %vm412_vm4, %v2303_v33 }
  0xc6   : > { %2310 = vmatpush1.msk.msra.mxu0 %vm416_vm2, %v1206_v32  ;;  %1283 = vmatprep.mubr.f32.mxu0 %v2416_v0 }
  0xcd   : > { %2311 = vmatmul.mubr.msk.f32.vlgmr.msra.gmra.mrb[0].mxu0 %vm412_vm4, %v2308_v8 }
 0x1a0   : > { %v1285_v35 = vpop.f32.mrb[0].mxu0 }
 0x1a1   : > { %v1298_v37 = vadd.f32 %v1296_v34, %v1285_v35  ;;  %v1287_v38 = vpop.f32.mrb[1].mxu0 }
 0x1a2   : > { %v1299_v40 = vadd.f32 %v1296_v34, %v1287_v38 }
 0x1a3   : > { %v1300_v41 = vmax.f32 %v1298_v37, 0.0 }
 0x1a4   : > { %v1301_v42 = vmax.f32 %v1299_v40, 0.0 }
 0x1a5   : > { %v1303_v43 = vsel %vm1302_vm10, %v1300_v41, 0.0 }
 0x1a6   : > { %v1304_v44 = vsel %vm1302_vm10, %v1301_v42, 0.0 }
 0x1a7   : > { %v1305_v46 = vadd.f32 %v1304_v44, %v1303_v43 }
 0x1a9   : > { %1306 = vadd.xlane.f32.xlu1 %v1305_v46 }
 0x1ba   : > { %1326 = vperm.xlu1 %2402, %v1323_v47  }
 0x236   : > { %v1307_v48 = vpop.xlane.xlu1 %1306 }
 0x237   : > { %v1308_v49 = vmul.f32 0.00390625, %v1307_v48  ;;  %v2323_v48 = vld [vmem:[%s2912_s6 + $0xc] sm:$0xf] }
 0x239   : > { %v1309_v50 = vsub.f32 %v1300_v41, %v1308_v49  ;;  %v1310_v51 = vsub.f32 %v1301_v42, %v1308_v49 }
 0x23a   : > { %v1327_v2 = vpop.permute.xlu1 %1326 }
 0x23b   : > { %v1311_v53 = vmul.f32 %v1309_v50, %v1309_v50  ;;  %v1312_v54 = vmul.f32 %v1310_v51, %v1310_v51 }
 0x23d   : > { %v1313_v55 = vsel %vm1302_vm10, %v1311_v53, 0.0  ;;  %v1314_v56 = vsel %vm1302_vm10, %v1312_v54, 0.0 }
 0x23e   : > { %v1315_v57 = vadd.f32 %v1314_v56, %v1313_v55 }
 0x240   : > { %1316 = vadd.xlane.f32.xlu0 %v1315_v57 }
 0x256   : > { %1334 = vperm.xlu0 %2401, %v1331_v58  }
 0x2cd   : > { %v1317_v60 = vpop.xlane.xlu0 %1316 }
 0x2ce   : > { %v1318_v62 = vmul.f32 0.00390625, %v1317_v60 }
 0x2d0   : > { %v1319_v63 = vadd.f32 1e-05, %v1318_v62 }
 0x2d2   : > { %2404 = vrsqrt.f32 %v1319_v63 }
 0x2d5   : > { %v1335_v10 = vpop.permute.xlu0 %1334 }
 0x2dc   : > { %v2405_v1 = vpop.eup %2404 }
 0x2dd   : > { %v1321_v3 = vmul.f32 %v2405_v1, %v1309_v50  ;;  %v1322_v4 = vmul.f32 %v2405_v1, %v1310_v51 }
 0x2df   : > { %v1329_v5 = vmul.f32 %v1327_v2, %v1321_v3  ;;  %v1330_v12 = vmul.f32 %v1327_v2, %v1322_v4 }
 0x2e1   : > { %v2748_v13 = vadd.f32 %v1335_v10, %v1329_v5  ;;  %v1338_v18 = vadd.f32 %v1335_v10, %v1330_v12  ;;  %v2339_v10 = vld [vmem:[%s2912_s6 + $0x1c] sm:$0xf] }
 0x2e3   : > { %1339 = vrot.lane.b32.xlu0 %v2748_v13, %s2417_s19  ;;  %1348 = vrot.lane.b32.xlu1 %v2748_v13, %s2418_s20 }
 0x2e7   : > { %1519 = vrot.lane.b32.xlu0 %v2748_v13, %s2419_s21  ;;  %1350 = vrot.lane.b32.xlu1 %v1338_v18, %s2418_s20 }
 0x2eb   : > { %1611 = vrot.lane.b32.xlu0 %v2748_v13, %s2420_s22  ;;  %1341 = vrot.lane.b32.xlu1 %v1338_v18, %s2417_s19 }
 0x2ef   : > { %1787 = vrot.lane.b32.xlu0 %v2748_v13, %s2421_s23  ;;  %1521 = vrot.lane.b32.xlu1 %v1338_v18, %s2419_s21 }
 0x2f3   : > { %1879 = vrot.lane.b32.xlu0 %v2748_v13, %s2422_s24  ;;  %1613 = vrot.lane.b32.xlu1 %v1338_v18, %s2420_s22 }
 0x2f7   : > { %1971 = vrot.lane.b32.xlu0 %v2748_v13, %s2423_s25  ;;  %1789 = vrot.lane.b32.xlu1 %v1338_v18, %s2421_s23 }
 0x2fb   : > { %2063 = vrot.lane.b32.xlu0 %v2748_v13, %s2424_s26  ;;  %1881 = vrot.lane.b32.xlu1 %v1338_v18, %s2422_s24 }
 0x2ff   : > { %2158 = vperm.xlu0 %2401, %v2155_v19   ;;  %1973 = vrot.lane.b32.xlu1 %v1338_v18, %s2423_s25 }
 0x303   : > { %2065 = vrot.lane.b32.xlu1 %v1338_v18, %s2424_s26 }
 0x355   : > { %v1349_v20 = vpop.permute.xlu1 %1348  ;;  %v1340_v21 = vpop.permute.xlu0 %1339 }
 0x359   : > { %v1351_v22 = vpop.permute.xlu1 %1350  ;;  %v1520_v8 = vpop.permute.xlu0 %1519 }
 0x35a   : > { %v1352_v24 = vsel %vm392_vm1, %v1349_v20, %v1351_v22  ;;  %v1353_v26 = vsel %vm392_vm1, %v1351_v22, %v1349_v20 }
 0x35b   : > { %v1354_v27 = vmul.f32 %v1353_v26, %v2558_v15  ;;  %v1355_v29 = vmul.f32 %v1352_v24, %v2561_v16 }
 0x35d   : > { %2313 = vmatprep.subr.msk.mxu1 %vm1302_vm10, %v1355_v29  ;;  %v1342_v9 = vpop.permute.xlu1 %1341 }
 0x35e   : > { %v1343_v32 = vsel %vm370_vm0, %v1340_v21, %v1342_v9  ;;  %v1344_v33 = vsel %vm370_vm0, %v1342_v9, %v1340_v21  ;;  %2314 = vmatpush1.msk.msra.mxu1 %vm1302_vm10, %v1354_v27 }
 0x35f   : > { %v1345_v15 = vmul.f32 %v1344_v33, %v2564_v17  ;;  %v1346_v16 = vmul.f32 %v1343_v32, %v2554_v14  ;;  %2315 = vmatmul.mubr.msk.f32.vlgmr.msra.gmra.mrb[0].mxu1 %vm1358_vm11, %v2312_v30  ;;  %v1347_v14 = vld [vmem:[%s2912_s6] sm:$0xf]  ;;  %v1612_v17 = vpop.permute.xlu0 %1611 }
 0x360   : > { %1512 = vmatprep.mubr.f32.mxu1 %v2416_v0 }
 0x361   : > { %2316 = vmatprep.subr.msk.mxu1 %vm1302_vm10, %v1346_v16  ;;  %v1522_v34 = vpop.permute.xlu1 %1521  ;;  %v2185_v16 = vld [vmem:[%s2914_s8] sm:$0xf] }
 0x362   : > { %v1523_v35 = vsel %vm578_vm3, %v1520_v8, %v1522_v34  ;;  %2317 = vmatpush1.msk.msra.mxu1 %vm1302_vm10, %v1345_v15  ;;  %v1524_v37 = vsel %vm578_vm3, %v1522_v34, %v1520_v8 }
 0x363   : > { %v1526_v38 = vmul.f32 %v1523_v35, %v2582_v28  ;;  %v1525_v41 = vmul.f32 %v1524_v37, %v2601_v36  ;;  %v2319_v36 = vld [vmem:[%s2912_s6 + $0x8] sm:$0xf]  ;;  %v1788_v46 = vpop.permute.xlu0 %1787 }
 0x365   : > { %2320 = vmatprep.subr.msk.mxu1 %vm1302_vm10, %v1526_v38  ;;  %v1614_v40 = vpop.permute.xlu1 %1613 }
 0x366   : > { %v1615_v42 = vsel %vm684_vm5, %v1612_v17, %v1614_v40  ;;  %v1616_v28 = vsel %vm684_vm5, %v1614_v40, %v1612_v17 }
 0x367   : > { %v1618_v43 = vmul.f32 %v1615_v42, %v2608_v39  ;;  %2318 = vmatmul.mubr.msk.f32.vlgmr.msra.gmra.mrb[0].mxu1 %vm1358_vm11, %v1347_v14  ;;  %v1617_v44 = vmul.f32 %v1616_v28, %v2620_v45  ;;  %v1880_v50 = vpop.permute.xlu0 %1879 }
 0x368   : > { %2321 = vmatpush1.msk.msra.mxu1 %vm1302_vm10, %v1525_v41  ;;  %1602 = vmatprep.mubr.f32.mxu1 %v2416_v0 }
 0x369   : > { %2324 = vmatprep.subr.msk.mxu1 %vm1302_vm10, %v1618_v43  ;;  %v1790_v39 = vpop.permute.xlu1 %1789 }
 0x36a   : > { %v1792_v47 = vsel %vm872_vm6, %v1790_v39, %v1788_v46  ;;  %v1791_v51 = vsel %vm872_vm6, %v1788_v46, %v1790_v39 }
 0x36b   : > { %v1794_v49 = vmul.f32 %v1792_v47, %v2640_v52  ;;  %v2327_v52 = vld [vmem:[%s2912_s6 + $0x10] sm:$0xf]  ;;  %v1793_v54 = vmul.f32 %v1791_v51, %v2656_v59  ;;  %v1972_v57 = vpop.permute.xlu0 %1971  ;;  %v2331_v59 = vld [vmem:[%s2912_s6 + $0x14] sm:$0xf] }
 0x36d   : > { %v1882_v45 = vpop.permute.xlu1 %1881 }
 0x36e   : > { %v1884_v53 = vsel %vm978_vm7, %v1882_v45, %v1880_v50  ;;  %v1883_v58 = vsel %vm978_vm7, %v1880_v50, %v1882_v45 }
 0x36f   : > { %2322 = vmatmul.mubr.msk.f32.vlgmr.msra.gmra.mrb[0].mxu1 %vm1358_vm11, %v2319_v36  ;;  %v1886_v55 = vmul.f32 %v1884_v53, %v2663_v61  ;;  %v1885_v61 = vmul.f32 %v1883_v58, %v2679_v6  ;;  %v2064_v1 = vpop.permute.xlu0 %2063  ;;  %v2335_v6 = vld [vmem:[%s2912_s6 + $0x18] sm:$0xf] }
 0x370   : > { %2325 = vmatpush1.msk.msra.mxu1 %vm1302_vm10, %v1617_v44  ;;  %1694 = vmatprep.mubr.f32.mxu1 %v2416_v0 }
 0x371   : > { %2328 = vmatprep.subr.msk.mxu1 %vm1302_vm10, %v1338_v18  ;;  %v1974_v56 = vpop.permute.xlu1 %1973 }
 0x372   : > { %v1976_v60 = vsel %vm1084_vm8, %v1974_v56, %v1972_v57  ;;  %v1975_v2 = vsel %vm1084_vm8, %v1972_v57, %v1974_v56 }
 0x373   : > { %v1978_v62 = vmul.f32 %v1976_v60, %v2686_v11  ;;  %v1977_v11 = vmul.f32 %v1975_v2, %v2702_v23  ;;  %v2343_v23 = vld [vmem:[%s2912_s6 + $0x20] sm:$0xf] }
 0x375   : > { %v2066_v63 = vpop.permute.xlu1 %2065 }
 0x376   : > { %v2068_v3 = vsel %vm1190_vm9, %v2066_v63, %v2064_v1  ;;  %v2067_v5 = vsel %vm1190_vm9, %v2064_v1, %v2066_v63 }
 0x377   : > { %2326 = vmatmul.mubr.msk.f32.vlgmr.msra.gmra.mrb[0].mxu1 %vm1358_vm11, %v2323_v48  ;;  %v2070_v4 = vmul.f32 %v2068_v3, %v2709_v25  ;;  %v2069_v12 = vmul.f32 %v2067_v5, %v2721_v31 }
 0x378   : > { %2329 = vmatpush1.msk.msra.mxu1 %vm1302_vm10, %v2748_v13  ;;  %1778 = vmatprep.mubr.f32.mxu1 %v2416_v0 }
 0x379   : > { %2332 = vmatprep.subr.msk.mxu1 %vm1302_vm10, %v1794_v49 }
 0x37e   : > { %v2159_v7 = vpop.permute.xlu0 %2158 }
 0x37f   : > { %2330 = vmatmul.mubr.msk.f32.vlgmr.msra.gmra.mrb[0].mxu1 %vm1358_vm11, %v2327_v52 }
 0x380   : > { %2333 = vmatpush1.msk.msra.mxu1 %vm1302_vm10, %v1793_v54  ;;  %1870 = vmatprep.mubr.f32.mxu1 %v2416_v0 }
 0x381   : > { %2336 = vmatprep.subr.msk.mxu1 %vm1302_vm10, %v1886_v55 }
 0x387   : > { %2334 = vmatmul.mubr.msk.f32.vlgmr.msra.gmra.mrb[0].mxu1 %vm1358_vm11, %v2331_v59 }
 0x388   : > { %2337 = vmatpush1.msk.msra.mxu1 %vm1302_vm10, %v1885_v61  ;;  %1962 = vmatprep.mubr.f32.mxu1 %v2416_v0 }
 0x389   : > { %2340 = vmatprep.subr.msk.mxu1 %vm1302_vm10, %v1978_v62 }
 0x38f   : > { %2338 = vmatmul.mubr.msk.f32.vlgmr.msra.gmra.mrb[0].mxu1 %vm1358_vm11, %v2335_v6 }
 0x390   : > { %2341 = vmatpush1.msk.msra.mxu1 %vm1302_vm10, %v1977_v11  ;;  %2054 = vmatprep.mubr.f32.mxu1 %v2416_v0 }
 0x391   : > { %2344 = vmatprep.subr.msk.mxu1 %vm1302_vm10, %v2070_v4 }
 0x397   : > { %2342 = vmatmul.mubr.msk.f32.vlgmr.msra.gmra.mrb[0].mxu1 %vm1358_vm11, %v2339_v10 }
 0x398   : > { %2345 = vmatpush1.msk.msra.mxu1 %vm1302_vm10, %v2069_v12  ;;  %2146 = vmatprep.mubr.f32.mxu1 %v2416_v0  ;;  %v2193_v0 = vld [vmem:[%s2915_s9] sm:$0xf] }
 0x39f   : > { %2346 = vmatmul.mubr.msk.f32.vlgmr.msra.gmra.mrb[0].mxu1 %vm1358_vm11, %v2343_v23 }
 0x472   : > { %v2148_v25 = vpop.f32.mrb[0].mxu1 }
 0x473   : > { %v2161_v13 = vadd.f32 %v2159_v7, %v2148_v25  ;;  %v2150_v18 = vpop.f32.mrb[1].mxu1 }
 0x474   : > { %v2162_v19 = vadd.f32 %v2159_v7, %v2150_v18 }
 0x475   : > { %v2163_v20 = vmax.f32 %v2161_v13, 0.0 }
 0x476   : > { %v2164_v21 = vmax.f32 %v2162_v19, 0.0 }
 0x477   : > { %v2165_v31 = vsel %vm416_vm2, %v2163_v20, 0.0 }
 0x478   : > { %v2166_v22 = vsel %vm416_vm2, %v2164_v21, 0.0 }
 0x479   : > { %v2167_v24 = vadd.f32 %v2166_v22, %v2165_v31 }
 0x47b   : > { %2168 = vadd.xlane.f32.xlu1 %v2167_v24 }
 0x48c   : > { %2196 = vperm.xlu1 %2402, %v2193_v0  }
 0x508   : > { %v2169_v26 = vpop.xlane.xlu1 %2168 }
 0x509   : > { %v2170_v27 = vmul.f32 0.00390625, %v2169_v26 }
 0x50b   : > { %v2171_v29 = vsub.f32 %v2163_v20, %v2170_v27  ;;  %v2172_v30 = vsub.f32 %v2164_v21, %v2170_v27 }
 0x50c   : > { %v2197_v43 = vpop.permute.xlu1 %2196 }
 0x50d   : > { %v2173_v9 = vmul.f32 %v2171_v29, %v2171_v29  ;;  %v2174_v32 = vmul.f32 %v2172_v30, %v2172_v30 }
 0x50f   : > { %v2175_v33 = vsel %vm416_vm2, %v2173_v9, 0.0  ;;  %v2176_v8 = vsel %vm416_vm2, %v2174_v32, 0.0 }
 0x510   : > { %v2177_v15 = vadd.f32 %v2176_v8, %v2175_v33 }
 0x512   : > { %2178 = vadd.xlane.f32.xlu0 %v2177_v15 }
 0x528   : > { %2188 = vperm.xlu0 %2401, %v2185_v16  }
 0x59f   : > { %v2179_v34 = vpop.xlane.xlu0 %2178 }
 0x5a0   : > { %v2180_v35 = vmul.f32 0.00390625, %v2179_v34 }
 0x5a2   : > { %v2181_v37 = vadd.f32 1e-05, %v2180_v35 }
 0x5a4   : > { %2406 = vrsqrt.f32 %v2181_v37 }
 0x5a7   : > { %v2189_v40 = vpop.permute.xlu0 %2188 }
 0x5ae   : > { %v2407_v38 = vpop.eup %2406 }
 0x5af   : > { %v2183_v14 = vmul.f32 %v2407_v38, %v2171_v29  ;;  %v2184_v17 = vmul.f32 %v2407_v38, %v2172_v30 }
 0x5b1   : > { %v2191_v41 = vmul.f32 %v2189_v40, %v2183_v14  ;;  %v2192_v42 = vmul.f32 %v2189_v40, %v2184_v17 }
 0x5b3   : > { %v2199_v28 = vadd.f32 %v2197_v43, %v2191_v41  ;;  %v2200_v36 = vadd.f32 %v2197_v43, %v2192_v42 }
 0x5b5   : > { %v2203_v44 = vcombine.low %v2199_v28, %v2200_v36 }
 0x5b7   : > { %2205 = vst [vmem:[%s359_s12] sm:$0xff] %v2203_v44 }
 0x5b8 PF: > { %s20_s13 = sadd.s32 1, %s2414_s13  }
 0x5b9   : > { %p17_p4 = scmp.ge.s32.totalorder %s20_s13, 4  }
 0x5bb   :  { %19 = sbr.rel (!%p17_p4) target bundleno = 1 (0x1), region = 113 }

</bundles_post_ra>
